<compile_context>
chip_gen: v7x
topology: tpu7x:2x2x1
jax: 0.10.0
libtpu: 0.0.40
codegen_flags: <defaults>
</compile_context>

<pallas_src>
import functools
import math

import jax
import jax.numpy as jnp
from jax.experimental import pallas as pl
from jax.experimental.pallas import tpu as pltpu

BN_EPS = 1e-5


def _round_up(v, m):
    return (v + m - 1) // m * m


def _linear_stats_kernel(x_ref, wt_ref, z_ref, sum_ref, sq_ref):
    """Pass 1: z = x @ W^T (bias cancelled by BN), per-feature sum / sumsq.

    grid = (feature_tiles [parallel], batch_tiles [arbitrary]).
    sum_ref / sq_ref are output-resident accumulators across the batch axis.
    """
    @pl.when(pl.program_id(1) == 0)
    def _():
        sum_ref[...] = jnp.zeros_like(sum_ref)
        sq_ref[...] = jnp.zeros_like(sq_ref)

    # Native-dtype operands, f32 accumulation on the MXU.
    z = jnp.dot(x_ref[...], wt_ref[...], preferred_element_type=jnp.float32)
    z_ref[...] = z
    # Concurrent sum and sum-of-squares reductions (no serial mean->var dep).
    sum_ref[...] += jnp.sum(z, axis=0, keepdims=True)
    sq_ref[...] += jnp.sum(z * z, axis=0, keepdims=True)


def _bn_apply_kernel(z_ref, sum_ref, sq_ref, gamma_ref, beta_ref, o_ref, *, inv_n):
    """Pass 2: fold BN into scale/shift and apply with a single FMA."""
    mean = sum_ref[...] * inv_n
    var = sq_ref[...] * inv_n - mean * mean
    scale = gamma_ref[...] * jax.lax.rsqrt(var + BN_EPS)   # tiny [1, bd] EUP work
    shift = beta_ref[...] - mean * scale
    o_ref[...] = (z_ref[...] * scale + shift).astype(o_ref.dtype)


@jax.jit
def _feature_block_impl(x, w, gamma, beta):
    n, k = x.shape
    d = w.shape[0]

    kp = _round_up(k, 128)   # contraction dim -> lane-aligned
    dp = _round_up(d, 128)   # output features -> lane-dense stores

    # Feature tile: full width when small, else 256 (v6e/v7x MXU native) / 128.
    if dp <= 512:
        bd = dp
    elif dp % 256 == 0:
        bd = 256
    else:
        bd = 128

    # Batch tile: multiple of 8 sublanes, capped so double-buffered x/z tiles
    # stay well inside v7x's scoped-VMEM default (32 MiB of 64 MiB physical).
    bn_cap = max(8, ((4 << 20) // (4 * 2 * (kp + bd))) // 8 * 8)
    bn = min(512, bn_cap, _round_up(n, 8))
    np_ = _round_up(n, bn)

    # Zero padding: padded rows/cols contribute nothing to the statistics
    # (the bias is dropped and the stat divisor is the true batch size n).
    xp = jnp.zeros((np_, kp), x.dtype).at[:n, :k].set(x)
    wtp = jnp.zeros((kp, dp), w.dtype).at[:k, :d].set(w.T)   # pre-transposed W
    gp = jnp.zeros((1, dp), jnp.float32).at[:, :d].set(
        gamma.reshape(1, -1).astype(jnp.float32))
    bp = jnp.zeros((1, dp), jnp.float32).at[:, :d].set(
        beta.reshape(1, -1).astype(jnp.float32))

    # ---- Pass 1: tiled matmul + batch statistics -------------------------
    z, s1, s2 = pl.pallas_call(
        _linear_stats_kernel,
        out_shape=(
            jax.ShapeDtypeStruct((np_, dp), jnp.float32),
            jax.ShapeDtypeStruct((1, dp), jnp.float32),
            jax.ShapeDtypeStruct((1, dp), jnp.float32),
        ),
        grid_spec=pltpu.PrefetchScalarGridSpec(
            num_scalar_prefetch=0,
            grid=(dp // bd, np_ // bn),
            in_specs=[
                pl.BlockSpec((bn, kp), lambda j, i: (i, 0)),
                pl.BlockSpec((kp, bd), lambda j, i: (0, j)),
            ],
            out_specs=[
                pl.BlockSpec((bn, bd), lambda j, i: (i, j)),
                pl.BlockSpec((1, bd), lambda j, i: (0, j)),
                pl.BlockSpec((1, bd), lambda j, i: (0, j)),
            ],
        ),
        compiler_params=pltpu.CompilerParams(
            dimension_semantics=("parallel", "arbitrary")),
    )(xp, wtp)

    # ---- Pass 2: folded BN scale/shift, in place over z -------------------
    y = pl.pallas_call(
        functools.partial(_bn_apply_kernel, inv_n=1.0 / n),
        out_shape=jax.ShapeDtypeStruct((np_, dp), jnp.float32),
        grid_spec=pltpu.PrefetchScalarGridSpec(
            num_scalar_prefetch=0,
            grid=(np_ // bn, dp // bd),
            in_specs=[
                pl.BlockSpec((bn, bd), lambda i, j: (i, j)),
                pl.BlockSpec((1, bd), lambda i, j: (0, j)),
                pl.BlockSpec((1, bd), lambda i, j: (0, j)),
                pl.BlockSpec((1, bd), lambda i, j: (0, j)),
                pl.BlockSpec((1, bd), lambda i, j: (0, j)),
            ],
            out_specs=pl.BlockSpec((bn, bd), lambda i, j: (i, j)),
        ),
        compiler_params=pltpu.CompilerParams(
            dimension_semantics=("parallel", "parallel")),
        input_output_aliases={0: 0},   # y overwrites z's HBM buffer
    )(z, s1, s2, gp, bp)

    return y[:n, :d]


def feature_block(x, w, b, gamma, beta):
    """x: [N, input_dim]; w: [low_dim, input_dim] (PyTorch layout);
    b/gamma/beta: [1, low_dim] (or [low_dim]).

    `b` is accepted for API parity but unused: training-mode BatchNorm1d
    subtracts the batch mean, which cancels the Linear bias exactly.
    """
    del b
    return _feature_block_impl(x, w, jnp.asarray(gamma), jnp.asarray(beta))


def init_params(key, input_dim, low_dim):
    """Deterministic init matching weights_init_kaiming."""
    k_w, k_g = jax.random.split(key)
    # Linear: kaiming_normal_(a=0, mode='fan_out') -> std = sqrt(2 / fan_out)
    std_w = math.sqrt(2.0 / low_dim)
    w = std_w * jax.random.normal(k_w, (low_dim, input_dim), jnp.float32)
    b = jnp.zeros((1, low_dim), jnp.float32)
    # BatchNorm1d: weight ~ N(1.0, 0.01), bias = 0
    gamma = 1.0 + 0.01 * jax.random.normal(k_g, (1, low_dim), jnp.float32)
    beta = jnp.zeros((1, low_dim), jnp.float32)
    return w, b, gamma, beta


def feature_block_ref(x, w, b, gamma, beta):
    """Pure-JAX reference (includes the bias; BN cancels it)."""
    z = x @ w.T + b
    mean = jnp.mean(z, axis=0, keepdims=True)
    var = jnp.mean((z - mean) ** 2, axis=0, keepdims=True)
    return gamma * (z - mean) / jnp.sqrt(var + BN_EPS) + beta


if __name__ == "__main__":
    key = jax.random.PRNGKey(0)
    k_x1, k_p1, k_x2, k_p2 = jax.random.split(key, 4)

    # Case 1: small toy shapes (single tile).
    batch, input_dim, low_dim = 8, 32, 16
    x1 = jax.random.normal(k_x1, (batch, input_dim), jnp.float32)
    w1, b1, g1, be1 = init_params(k_p1, input_dim, low_dim)
    out1 = jax.block_until_ready(feature_block(x1, w1, b1, g1, be1))
    ref1 = feature_block_ref(x1, w1, b1, g1, be1)
    assert out1.shape == (batch, low_dim)
    assert jnp.allclose(out1, ref1, atol=1e-4, rtol=1e-4), "case 1 mismatch"

    # Case 2: ragged shapes exercising padding + multi-batch-tile accumulation.
    batch2, input_dim2, low_dim2 = 600, 50, 30
    x2 = jax.random.normal(k_x2, (batch2, input_dim2), jnp.float32)
    w2, b2, g2, be2 = init_params(k_p2, input_dim2, low_dim2)
    out2 = jax.block_until_ready(feature_block(x2, w2, b2, g2, be2))
    ref2 = feature_block_ref(x2, w2, b2, g2, be2)
    assert out2.shape == (batch2, low_dim2)
    assert jnp.allclose(out2, ref2, atol=1e-4, rtol=1e-4), "case 2 mismatch"

    print("KERNEL_OK")
</pallas_src>

<mosaic_0001>
module attributes {stable_mosaic.version = 11 : i64} {
  func.func @_linear_stats_kernel(%arg0: i32, %arg1: i32, %arg2: memref<8x128xf32, #tpu.memory_space<vmem>>, %arg3: memref<128x128xf32, #tpu.memory_space<vmem>>, %arg4: memref<8x128xf32, #tpu.memory_space<vmem>>, %arg5: memref<1x128xf32, #tpu.memory_space<vmem>>, %arg6: memref<1x128xf32, #tpu.memory_space<vmem>>) attributes {dimension_semantics = [#tpu.dimension_semantics<parallel>, #tpu.dimension_semantics<arbitrary>], iteration_bounds = array<i64: 1, 1>, scalar_prefetch = 0 : i64, scratch_operands = 0 : i64, tpu.core_type = #tpu.core_type<tc>, window_params = [{transform_indices = @transform_0, window_bounds = array<i64: 8, 128>}, {transform_indices = @transform_1, window_bounds = array<i64: 128, 128>}, {transform_indices = @transform_2, window_bounds = array<i64: 8, 128>}, {transform_indices = @transform_3, window_bounds = array<i64: 1, 128>}, {transform_indices = @transform_4, window_bounds = array<i64: 1, 128>}]} {
    %c0_i32 = arith.constant 0 : i32
    %0 = arith.cmpi eq, %arg1, %c0_i32 : i32
    %1 = arith.extui %0 : i1 to i32
    %c0_i32_0 = arith.constant 0 : i32
    %2 = arith.cmpi ne, %1, %c0_i32_0 : i32
    scf.if %2 {
      %cst_16 = arith.constant 0.000000e+00 : f32
      %18 = vector.broadcast %cst_16 : f32 to vector<1x128xf32>
      %c0_17 = arith.constant 0 : index
      %c0_18 = arith.constant 0 : index
      %19 = vector.load %arg5[%c0_17, %c0_18] : memref<1x128xf32, #tpu.memory_space<vmem>>, vector<1x128xf32>
      tpu.vector_store %arg5[%c0_17, %c0_18], %18 {strides = array<i32>} : memref<1x128xf32, #tpu.memory_space<vmem>>, vector<1x128xf32>,
      %cst_19 = arith.constant 0.000000e+00 : f32
      %20 = vector.broadcast %cst_19 : f32 to vector<1x128xf32>
      %c0_20 = arith.constant 0 : index
      %c0_21 = arith.constant 0 : index
      %21 = vector.load %arg6[%c0_20, %c0_21] : memref<1x128xf32, #tpu.memory_space<vmem>>, vector<1x128xf32>
      tpu.vector_store %arg6[%c0_20, %c0_21], %20 {strides = array<i32>} : memref<1x128xf32, #tpu.memory_space<vmem>>, vector<1x128xf32>,
    } else {
    }
    %c0 = arith.constant 0 : index
    %c0_1 = arith.constant 0 : index
    %3 = vector.load %arg2[%c0, %c0_1] : memref<8x128xf32, #tpu.memory_space<vmem>>, vector<8x128xf32>
    %c0_2 = arith.constant 0 : index
    %c0_3 = arith.constant 0 : index
    %4 = vector.load %arg3[%c0_2, %c0_3] : memref<128x128xf32, #tpu.memory_space<vmem>>, vector<128x128xf32>
    %cst = arith.constant dense<0.000000e+00> : vector<8x128xf32>
    %5 = tpu.matmul %3, %4, %cst {dimension_numbers = #tpu.dot_dimension_numbers<[1], [0], [0], [1], [0, 0, 1, 1], [], []>} : vector<8x128xf32>, vector<128x128xf32>, vector<8x128xf32> -> vector<8x128xf32>
    %c0_4 = arith.constant 0 : index
    %c0_5 = arith.constant 0 : index
    %6 = vector.load %arg4[%c0_4, %c0_5] : memref<8x128xf32, #tpu.memory_space<vmem>>, vector<8x128xf32>
    tpu.vector_store %arg4[%c0_4, %c0_5], %5 {strides = array<i32>} : memref<8x128xf32, #tpu.memory_space<vmem>>, vector<8x128xf32>,
    %c0_6 = arith.constant 0 : index
    %c0_7 = arith.constant 0 : index
    %7 = vector.load %arg5[%c0_6, %c0_7] : memref<1x128xf32, #tpu.memory_space<vmem>>, vector<1x128xf32>
    %cst_8 = arith.constant dense<0.000000e+00> : vector<128xf32>
    %8 = vector.multi_reduction <add>, %5, %cst_8 [0] : vector<8x128xf32> to vector<128xf32>
    %9 = vector.shape_cast %8 : vector<128xf32> to vector<1x128xf32>
    %10 = arith.addf %7, %9 : vector<1x128xf32>
    %c0_9 = arith.constant 0 : index
    %c0_10 = arith.constant 0 : index
    %11 = vector.load %arg5[%c0_9, %c0_10] : memref<1x128xf32, #tpu.memory_space<vmem>>, vector<1x128xf32>
    tpu.vector_store %arg5[%c0_9, %c0_10], %10 {strides = array<i32>} : memref<1x128xf32, #tpu.memory_space<vmem>>, vector<1x128xf32>,
    %c0_11 = arith.constant 0 : index
    %c0_12 = arith.constant 0 : index
    %12 = vector.load %arg6[%c0_11, %c0_12] : memref<1x128xf32, #tpu.memory_space<vmem>>, vector<1x128xf32>
    %13 = arith.mulf %5, %5 : vector<8x128xf32>
    %cst_13 = arith.constant dense<0.000000e+00> : vector<128xf32>
    %14 = vector.multi_reduction <add>, %13, %cst_13 [0] : vector<8x128xf32> to vector<128xf32>
    %15 = vector.shape_cast %14 : vector<128xf32> to vector<1x128xf32>
    %16 = arith.addf %12, %15 : vector<1x128xf32>
    %c0_14 = arith.constant 0 : index
    %c0_15 = arith.constant 0 : index
    %17 = vector.load %arg6[%c0_14, %c0_15] : memref<1x128xf32, #tpu.memory_space<vmem>>, vector<1x128xf32>
    tpu.vector_store %arg6[%c0_14, %c0_15], %16 {strides = array<i32>} : memref<1x128xf32, #tpu.memory_space<vmem>>, vector<1x128xf32>,
    return
  }
  func.func @transform_0(%arg0: i32, %arg1: i32) -> (i32, i32) {
    %c0_i32 = arith.constant 0 : i32
    %c0_i32_0 = arith.constant 0 : i32
    return %arg1, %c0_i32 : i32, i32
  }
  func.func @transform_1(%arg0: i32, %arg1: i32) -> (i32, i32) {
    %c0_i32 = arith.constant 0 : i32
    %c0_i32_0 = arith.constant 0 : i32
    return %c0_i32, %arg0 : i32, i32
  }
  func.func @transform_2(%arg0: i32, %arg1: i32) -> (i32, i32) {
    %c0_i32 = arith.constant 0 : i32
    return %arg1, %arg0 : i32, i32
  }
  func.func @transform_3(%arg0: i32, %arg1: i32) -> (i32, i32) {
    %c0_i32 = arith.constant 0 : i32
    %c0_i32_0 = arith.constant 0 : i32
    return %c0_i32, %arg0 : i32, i32
  }
  func.func @transform_4(%arg0: i32, %arg1: i32) -> (i32, i32) {
    %c0_i32 = arith.constant 0 : i32
    %c0_i32_0 = arith.constant 0 : i32
    return %c0_i32, %arg0 : i32, i32
  }
}

module attributes {stable_mosaic.version = 11 : i64} {
  func.func @_bn_apply_kernel(%arg0: i32, %arg1: i32, %arg2: memref<8x128xf32, #tpu.memory_space<vmem>>, %arg3: memref<1x128xf32, #tpu.memory_space<vmem>>, %arg4: memref<1x128xf32, #tpu.memory_space<vmem>>, %arg5: memref<1x128xf32, #tpu.memory_space<vmem>>, %arg6: memref<1x128xf32, #tpu.memory_space<vmem>>, %arg7: memref<8x128xf32, #tpu.memory_space<vmem>>) attributes {dimension_semantics = [#tpu.dimension_semantics<parallel>, #tpu.dimension_semantics<parallel>], iteration_bounds = array<i64: 1, 1>, scalar_prefetch = 0 : i64, scratch_operands = 0 : i64, tpu.core_type = #tpu.core_type<tc>, window_params = [{transform_indices = @transform_0, window_bounds = array<i64: 8, 128>}, {transform_indices = @transform_1, window_bounds = array<i64: 1, 128>}, {transform_indices = @transform_2, window_bounds = array<i64: 1, 128>}, {transform_indices = @transform_3, window_bounds = array<i64: 1, 128>}, {transform_indices = @transform_4, window_bounds = array<i64: 1, 128>}, {transform_indices = @transform_5, window_bounds = array<i64: 8, 128>}]} {
    %c0 = arith.constant 0 : index
    %c0_0 = arith.constant 0 : index
    %0 = vector.load %arg3[%c0, %c0_0] : memref<1x128xf32, #tpu.memory_space<vmem>>, vector<1x128xf32>
    %cst = arith.constant 1.250000e-01 : f32
    %1 = vector.broadcast %cst : f32 to vector<1x128xf32>
    %2 = arith.mulf %0, %1 : vector<1x128xf32>
    %c0_1 = arith.constant 0 : index
    %c0_2 = arith.constant 0 : index
    %3 = vector.load %arg4[%c0_1, %c0_2] : memref<1x128xf32, #tpu.memory_space<vmem>>, vector<1x128xf32>
    %cst_3 = arith.constant 1.250000e-01 : f32
    %4 = vector.broadcast %cst_3 : f32 to vector<1x128xf32>
    %5 = arith.mulf %3, %4 : vector<1x128xf32>
    %6 = arith.mulf %2, %2 : vector<1x128xf32>
    %7 = arith.subf %5, %6 : vector<1x128xf32>
    %c0_4 = arith.constant 0 : index
    %c0_5 = arith.constant 0 : index
    %8 = vector.load %arg5[%c0_4, %c0_5] : memref<1x128xf32, #tpu.memory_space<vmem>>, vector<1x128xf32>
    %cst_6 = arith.constant 9.99999974E-6 : f32
    %9 = vector.broadcast %cst_6 : f32 to vector<1x128xf32>
    %10 = arith.addf %7, %9 : vector<1x128xf32>
    %11 = math.rsqrt %10 : vector<1x128xf32>
    %12 = arith.mulf %8, %11 : vector<1x128xf32>
    %c0_7 = arith.constant 0 : index
    %c0_8 = arith.constant 0 : index
    %13 = vector.load %arg6[%c0_7, %c0_8] : memref<1x128xf32, #tpu.memory_space<vmem>>, vector<1x128xf32>
    %14 = arith.mulf %2, %12 : vector<1x128xf32>
    %15 = arith.subf %13, %14 : vector<1x128xf32>
    %c0_9 = arith.constant 0 : index
    %c0_10 = arith.constant 0 : index
    %16 = vector.load %arg2[%c0_9, %c0_10] : memref<8x128xf32, #tpu.memory_space<vmem>>, vector<8x128xf32>
    %17 = vector.broadcast %12 : vector<1x128xf32> to vector<8x128xf32>
    %18 = arith.mulf %16, %17 : vector<8x128xf32>
    %19 = vector.broadcast %15 : vector<1x128xf32> to vector<8x128xf32>
    %20 = arith.addf %18, %19 : vector<8x128xf32>
    %c0_11 = arith.constant 0 : index
    %c0_12 = arith.constant 0 : index
    %21 = vector.load %arg7[%c0_11, %c0_12] : memref<8x128xf32, #tpu.memory_space<vmem>>, vector<8x128xf32>
    tpu.vector_store %arg7[%c0_11, %c0_12], %20 {strides = array<i32>} : memref<8x128xf32, #tpu.memory_space<vmem>>, vector<8x128xf32>,
    return
  }
  func.func @transform_0(%arg0: i32, %arg1: i32) -> (i32, i32) {
    %c0_i32 = arith.constant 0 : i32
    return %arg0, %arg1 : i32, i32
  }
  func.func @transform_1(%arg0: i32, %arg1: i32) -> (i32, i32) {
    %c0_i32 = arith.constant 0 : i32
    %c0_i32_0 = arith.constant 0 : i32
    return %c0_i32, %arg1 : i32, i32
  }
  func.func @transform_2(%arg0: i32, %arg1: i32) -> (i32, i32) {
    %c0_i32 = arith.constant 0 : i32
    %c0_i32_0 = arith.constant 0 : i32
    return %c0_i32, %arg1 : i32, i32
  }
  func.func @transform_3(%arg0: i32, %arg1: i32) -> (i32, i32) {
    %c0_i32 = arith.constant 0 : i32
    %c0_i32_0 = arith.constant 0 : i32
    return %c0_i32, %arg1 : i32, i32
  }
  func.func @transform_4(%arg0: i32, %arg1: i32) -> (i32, i32) {
    %c0_i32 = arith.constant 0 : i32
    %c0_i32_0 = arith.constant 0 : i32
    return %c0_i32, %arg1 : i32, i32
  }
  func.func @transform_5(%arg0: i32, %arg1: i32) -> (i32, i32) {
    %c0_i32 = arith.constant 0 : i32
    return %arg0, %arg1 : i32, i32
  }
}

</mosaic_0001>

<bundles_post_ra>
// kernel: _feature_block_impl.3
= control target key start
LH: loop header
LB: loop body
LE: loop exit
PB: predicated region body
PF: predicated region fallthrough
CT: control target
= control target key end

     0   :  { %v35_v7 = vlaneseq  ;;  %s103_s1 = inlined_call_operand.vmem [shape: f32[1,128], index: 1, kind: input, shape index: {}]   ;;  %s104_s2 = inlined_call_operand.vmem [shape: f32[1,128], index: 2, kind: input, shape index: {}]   ;;  %s105_s3 = inlined_call_operand.vmem [shape: f32[1,128], index: 3, kind: input, shape index: {}]   ;;  %s106_s0 = inlined_call_operand.vmem [shape: f32[8,128], index: 0, kind: input, shape index: {}, may-alias: {0,5}]   ;;  %s107_s4 = inlined_call_operand.vmem [shape: f32[1,128], index: 4, kind: input, shape index: {}]   ;;  %s108_s5 = inlined_call_operand.vmem [shape: f32[8,128], index: 5, kind: output, shape index: {}, may-alias: {0,5}]  }
   0x1   :  { %v20_v0 = vld [vmem:[%s103_s1] sm:$0x1] }
   0x2   :  { %v22_v1 = vld [vmem:[%s104_s2] sm:$0x1]  ;;  %v21_v2 = vmul.f32 0.125, %v20_v0  ;;  %v36_v8 = vshrl.u32 %v35_v7, 7 }
   0x3   :  { %v23_v3 = vmul.f32 0.125, %v22_v1  ;;  %v26_v9 = vld [vmem:[%s105_s3] sm:$0x1] }
   0x4   :  { %v24_v4 = vmul.f32 %v21_v2, %v21_v2  ;;  %v37_v10 = vsub.s32 0, %v36_v8  ;;  %v30_v13 = vld [vmem:[%s107_s4] sm:$0x1] }
   0x5   :  { %v33_v14 = vld [vmem:[%s106_s0] sm:$0xff] }
   0x6   :  { %v25_v5 = vsub.f32 %v23_v3, %v24_v4 }
   0x8   :  { %v27_v6 = vadd.f32 1e-05, %v25_v5 }
   0xa   :  { %53 = vrsqrt.f32 %v27_v6 }
  0x14   :  { %v54_v11 = vpop.eup %53 }
  0x15   :  { %v29_v12 = vmul.f32 %v54_v11, %v26_v9 }
  0x17   :  { %v31_v15 = vmul.f32 %v29_v12, %v21_v2  ;;  %v38_v16 = vrot.slane %v29_v12, %v37_v10 }
  0x19   :  { %v32_v17 = vsub.f32 %v30_v13, %v31_v15  ;;  %v40_v18 = vmul.f32 %v38_v16, %v33_v14 }
  0x1b   :  { %v45_v19 = vrot.slane %v32_v17, %v37_v10 }
  0x1d   :  { %v47_v20 = vadd.f32 %v45_v19, %v40_v18 }
  0x1f   :  { %48 = vst [vmem:[%s108_s5] sm:$0xff] %v47_v20 }

// kernel: _feature_block_impl.2
= control target key start
LH: loop header
LB: loop body
LE: loop exit
PB: predicated region body
PF: predicated region fallthrough
CT: control target
= control target key end

     0   :  { %v218_v0 = vmov 0.0|0.0   ;;  %v219_v4 = vmov 0.0   ;;  %vm220_vm0 = vmmov 0   ;;  %s318_s1 = inlined_call_operand.vmem [shape: f32[128,128], index: 1, kind: input, shape index: {}]   ;;  %s319_s3 = inlined_call_operand.vmem [shape: f32[1,128], index: 3, kind: output, shape index: {1}]   ;;  %s320_s4 = inlined_call_operand.vmem [shape: f32[1,128], index: 4, kind: output, shape index: {2}]   ;;  %s321_s0 = inlined_call_operand.vmem [shape: f32[8,128], index: 0, kind: input, shape index: {}]   ;;  %s322_s2 = inlined_call_operand.vmem [shape: f32[8,128], index: 2, kind: output, shape index: {0}]  }
   0x1   :  { %191 = vmatprep.subr.bf16.mxu0 %v218_v0  ;;  %v21_v1 = vld [vmem:[%s318_s1] sm:$0xff]  ;;  %v22_v2 = vld [vmem:[%s318_s1 + $0x8] sm:$0xff]  ;;  %v23_v3 = vld [vmem:[%s318_s1 + $0x10] sm:$0xff]  ;;  %18 = vst [vmem:[%s319_s3] sm:$0x1] %v219_v4  ;;  %188 = vmatprep.mubr.msk.f32.mxu0 %vm220_vm0, %v219_v4 }
   0x2   :  { %19 = vst [vmem:[%s320_s4] sm:$0x1] %v219_v4  ;;  %v192_v5 = vpack.c.bf16 %v22_v2, %v21_v1  ;;  %v24_v6 = vld [vmem:[%s318_s1 + $0x18] sm:$0xff]  ;;  %v25_v8 = vld [vmem:[%s318_s1 + $0x20] sm:$0xff]  ;;  %v26_v9 = vld [vmem:[%s318_s1 + $0x28] sm:$0xff] }
   0x3   :  { %v195_v7 = vpack.c.bf16 %v24_v6, %v23_v3  ;;  %v198_v10 = vpack.c.bf16 %v26_v9, %v25_v8  ;;  %v27_v11 = vld [vmem:[%s318_s1 + $0x30] sm:$0xff]  ;;  %v28_v12 = vld [vmem:[%s318_s1 + $0x38] sm:$0xff]  ;;  %v29_v14 = vld [vmem:[%s318_s1 + $0x40] sm:$0xff] }
   0x4   :  { %193 = vmatpush3.bf16.msra.mxu0 %v192_v5  ;;  %v201_v13 = vpack.c.bf16 %v28_v12, %v27_v11  ;;  %v30_v15 = vld [vmem:[%s318_s1 + $0x48] sm:$0xff]  ;;  %v31_v17 = vld [vmem:[%s318_s1 + $0x50] sm:$0xff]  ;;  %v32_v18 = vld [vmem:[%s318_s1 + $0x58] sm:$0xff] }
   0x5   :  { %194 = vmatprep.subr.bf16.mxu0 %v218_v0  ;;  %v204_v16 = vpack.c.bf16 %v30_v15, %v29_v14  ;;  %v207_v19 = vpack.c.bf16 %v32_v18, %v31_v17  ;;  %v33_v20 = vld [vmem:[%s318_s1 + $0x60] sm:$0xff]  ;;  %v34_v21 = vld [vmem:[%s318_s1 + $0x68] sm:$0xff]  ;;  %v35_v23 = vld [vmem:[%s318_s1 + $0x70] sm:$0xff] }
   0x6   :  { %v210_v22 = vpack.c.bf16 %v34_v21, %v33_v20  ;;  %v36_v24 = vld [vmem:[%s318_s1 + $0x78] sm:$0xff]  ;;  %v20_v26 = vld [vmem:[%s321_s0] sm:$0xff] }
   0x7   :  { %v213_v25 = vpack.c.bf16 %v36_v24, %v35_v23 }
   0x8   :  { %196 = vmatpush3.bf16.msra.mxu0 %v195_v7  ;;  %v108_v39 = vld [vmem:[%s319_s3] sm:$0x1] }
   0x9   :  { %197 = vmatprep.subr.bf16.mxu0 %v218_v0  ;;  %v117_v42 = vld [vmem:[%s320_s4] sm:$0x1] }
   0xc   :  { %199 = vmatpush3.bf16.msra.mxu0 %v198_v10 }
   0xd   :  { %200 = vmatprep.subr.bf16.mxu0 %v218_v0 }
  0x10   :  { %202 = vmatpush3.bf16.msra.mxu0 %v201_v13 }
  0x11   :  { %203 = vmatprep.subr.bf16.mxu0 %v218_v0 }
  0x14   :  { %205 = vmatpush3.bf16.msra.mxu0 %v204_v16 }
  0x15   :  { %206 = vmatprep.subr.bf16.mxu0 %v218_v0 }
  0x18   :  { %208 = vmatpush3.bf16.msra.mxu0 %v207_v19 }
  0x19   :  { %209 = vmatprep.subr.bf16.mxu0 %v218_v0 }
  0x1c   :  { %211 = vmatpush3.bf16.msra.mxu0 %v210_v22 }
  0x1d   :  { %212 = vmatprep.subr.bf16.mxu0 %v218_v0 }
  0x20   :  { %214 = vmatpush3.bf16.msra.mxu0 %v213_v25 }
  0x23   :  { %189 = vmatmul.mubr.f32.vlgmr.msra.gmra.mrb[0].mxu0 %v20_v26 }
  0xf6   :  { %v103_v27 = vpop.f32.mrb[0].mxu0 }
  0xf7   :  { %107 = vst [vmem:[%s322_s2] sm:$0xff] %v103_v27  ;;  %v109_v28 = vrot.slane %v103_v27, 4  ;;  %v118_v29 = vmul.f32 %v103_v27, %v103_v27  ;;  %v190_v30 = vpop.f32.mrb[1].mxu0 }
  0xf9   :  { %v110_v31 = vadd.f32 %v109_v28, %v103_v27  ;;  %v119_v32 = vrot.slane %v118_v29, 4 }
  0xfb   :  { %v111_v33 = vrot.slane %v110_v31, 2  ;;  %v120_v34 = vadd.f32 %v119_v32, %v118_v29 }
  0xfd   :  { %v112_v35 = vadd.f32 %v111_v33, %v110_v31  ;;  %v121_v36 = vrot.slane %v120_v34, 2 }
  0xff   :  { %v113_v37 = vrot.slane %v112_v35, 1  ;;  %v122_v38 = vadd.f32 %v121_v36, %v120_v34 }
 0x101   :  { %v114_v40 = vadd.f32 %v113_v37, %v112_v35  ;;  %v123_v41 = vrot.slane %v122_v38, 1 }
 0x103   :  { %v115_v43 = vadd.f32 %v114_v40, %v108_v39  ;;  %v124_v44 = vadd.f32 %v123_v41, %v122_v38 }
 0x105   :  { %116 = vst [vmem:[%s319_s3] sm:$0x1] %v115_v43  ;;  %v125_v45 = vadd.f32 %v124_v44, %v117_v42 }
 0x107   :  { %126 = vst [vmem:[%s320_s4] sm:$0x1] %v125_v45 }

</bundles_post_ra>
